<compile_context>
chip_gen: v5e
topology: v5e:2x2
jax: 0.10.0
libtpu: 0.0.40
codegen_flags: <defaults>
</compile_context>

<pallas_src>
import jax
import jax.numpy as jnp
from jax.experimental import pallas as pl
from jax.experimental.pallas import tpu as pltpu


def mlp_kernel(x_ref, w1_ref, b1_ref, w2_ref, b2_ref, o_ref):
    # Layer 1 on the MXU: (blk, F) @ (F, M) with f32 accumulate; bias + ReLU on the VPU.
    h = jnp.dot(x_ref[...], w1_ref[...], preferred_element_type=jnp.float32)
    h = jnp.maximum(h + b1_ref[...], 0.0)
    # Layer 2 (out_features == 1): contract h's M axis against the (1, M) weight
    # row (q @ k^T-style dot_general) so the result is a lane-dense (1, blk) row.
    # This avoids the masked single-lane stores a (blk, 1) column output forces.
    y = jax.lax.dot_general(
        w2_ref[...], h, (((1,), (1,)), ((), ())),
        preferred_element_type=jnp.float32)            # (1, blk)
    o_ref[...] = (y + b2_ref[0, 0]).astype(o_ref.dtype)


def _round_up(x, m):
    return (x + m - 1) // m * m


def _choose_block(batch, tm):
    # Small batch: a single full-batch tile (block == full array dims is always a
    # legal tiling) -- no per-step overhead, nothing to split.
    if batch <= 256:
        return batch
    # Large batch: big 128-aligned tiles (lane-aligned output blocks, sublane-
    # aligned x blocks), capped so the grid has >= 2 steps and the "parallel"
    # batch axis can be sharded across v7x's two TensorCores.
    return min(tm, _round_up(pl.cdiv(batch, 2), 128))


def mlp_forward(x, w1, b1, w2_row, b2, *, tm=512, compute_dtype=None):
    """x: (B, F); w1: (F, M); b1: (1, M); w2_row: (1, M); b2: (1, 1) -> (B, 1).

    tm: max batch tile (multiple of 128; 512-2048 is the sweet spot between
        per-grid-step overhead and VMEM use -- sweep per chip).
    compute_dtype: optionally jnp.bfloat16 to halve the dominant x-read HBM
        traffic; the MXU still accumulates in f32 (numerics shift slightly).
    """
    B, F = x.shape
    M = w1.shape[1]
    assert tm % 128 == 0

    if compute_dtype is not None:
        x = x.astype(compute_dtype)
        w1 = w1.astype(compute_dtype)

    blk = _choose_block(B, tm)
    num_tiles = pl.cdiv(B, blk)

    # Lane-dense output: each grid step writes one (1, blk) row into a
    # (1, num_tiles * blk) slab. x is NOT padded in the wrapper: the grid is
    # ragged (the last tile may read past B); garbage rows only land in output
    # lanes >= B, which the final slice drops.
    out = pl.pallas_call(
        mlp_kernel,
        out_shape=jax.ShapeDtypeStruct((1, num_tiles * blk), jnp.float32),
        grid=(num_tiles,),
        in_specs=[
            # x tile marches over the batch grid.
            pl.BlockSpec((blk, F), lambda i: (i, 0)),
            # Weights / biases stay VMEM-resident across the whole grid.
            # NOTE: Pallas double-buffers these even with a constant index map;
            # if F*M grows past a few MiB (v7x has only 64 MiB VMEM), add a
            # reduction grid axis tiling F instead of loading W1 whole.
            pl.BlockSpec((F, M), lambda i: (0, 0)),
            pl.BlockSpec((1, M), lambda i: (0, 0)),
            pl.BlockSpec((1, M), lambda i: (0, 0)),
            # Single scalar bias lives in SMEM instead of burning a vreg tile.
            pl.BlockSpec((1, 1), lambda i: (0, 0), memory_space=pltpu.SMEM),
        ],
        out_specs=pl.BlockSpec((1, blk), lambda i: (0, i)),
        compiler_params=pltpu.CompilerParams(
            # Batch axis is independent -> v7x can split it across its 2 TCs.
            dimension_semantics=("parallel",),
        ),
        cost_estimate=pl.CostEstimate(
            flops=2 * B * F * M + 2 * B * M,
            transcendentals=0,
            bytes_accessed=(x.size * x.dtype.itemsize
                            + w1.size * w1.dtype.itemsize
                            + b1.size * 4 + w2_row.size * 4 + 4
                            + B * 4),
        ),
    )(x, w1, b1, w2_row, b2)

    # Tiny (a few KiB) slice/reshape of the lane-dense slab back to (B, 1).
    return out[0, :B].reshape(B, 1)


def init_params(key, in_features, middle1):
    # Deterministic init mimicking nn.Linear's uniform(-1/sqrt(fan_in), 1/sqrt(fan_in)).
    k1, k2, k3, k4 = jax.random.split(key, 4)
    bound1 = 1.0 / jnp.sqrt(in_features)
    bound2 = 1.0 / jnp.sqrt(middle1)
    # layer1 stored pre-transposed: (in, out)
    w1 = jax.random.uniform(k1, (in_features, middle1), jnp.float32, -bound1, bound1)
    b1 = jax.random.uniform(k2, (1, middle1), jnp.float32, -bound1, bound1)
    # layer2 weight as a (1, middle1) row (PyTorch stores it as (1, middle1) already).
    w2_row = jax.random.uniform(k3, (1, middle1), jnp.float32, -bound2, bound2)
    b2 = jax.random.uniform(k4, (1, 1), jnp.float32, -bound2, bound2)
    return w1, b1, w2_row, b2


if __name__ == "__main__":
    in_features = 32
    middle1 = 64

    key = jax.random.PRNGKey(0)
    kx, kp = jax.random.split(key)
    w1, b1, w2_row, b2 = init_params(kp, in_features, middle1)

    def reference(x):
        # Matches nn.Linear -> ReLU -> nn.Linear.
        return jnp.maximum(x @ w1 + b1, 0.0) @ w2_row.T + b2

    # 1) Small-batch path: single full-batch tile.
    x_small = jax.random.normal(kx, (8, in_features), jnp.float32)
    out_small = mlp_forward(x_small, w1, b1, w2_row, b2)
    jax.block_until_ready(out_small)
    assert out_small.shape == (8, 1)
    assert jnp.allclose(out_small, reference(x_small), atol=1e-5, rtol=1e-5)

    # 2) Multi-tile ragged path: grid of 2 (v7x two-TC sizing rule), last x tile
    #    reads past B with no wrapper-side padding.
    x_big = jax.random.normal(kx, (384, in_features), jnp.float32)
    out_big = mlp_forward(x_big, w1, b1, w2_row, b2)
    jax.block_until_ready(out_big)
    assert out_big.shape == (384, 1)
    assert jnp.allclose(out_big, reference(x_big), atol=1e-4, rtol=1e-4)

    print("KERNEL_OK")
</pallas_src>

<mosaic_0001>
module attributes {stable_mosaic.version = 11 : i64} {
  func.func @mlp_kernel(%arg0: i32, %arg1: memref<8x32xf32, #tpu.memory_space<vmem>>, %arg2: memref<32x64xf32, #tpu.memory_space<vmem>>, %arg3: memref<1x64xf32, #tpu.memory_space<vmem>>, %arg4: memref<1x64xf32, #tpu.memory_space<vmem>>, %arg5: memref<1x1xf32, #tpu.memory_space<smem>>, %arg6: memref<1x8xf32, #tpu.memory_space<vmem>>) attributes {dimension_semantics = [#tpu.dimension_semantics<parallel>], iteration_bounds = array<i64: 1>, scalar_prefetch = 0 : i64, scratch_operands = 0 : i64, tpu.core_type = #tpu.core_type<tc>, window_params = [{transform_indices = @transform_0, window_bounds = array<i64: 8, 32>}, {pipeline_mode = #tpu.pipeline_mode<synchronous>, transform_indices = @transform_1, window_bounds = array<i64: 32, 64>}, {pipeline_mode = #tpu.pipeline_mode<synchronous>, transform_indices = @transform_2, window_bounds = array<i64: 1, 64>}, {pipeline_mode = #tpu.pipeline_mode<synchronous>, transform_indices = @transform_3, window_bounds = array<i64: 1, 64>}, {transform_indices = @transform_4, window_bounds = array<i64: 1, 1>}, {transform_indices = @transform_5, window_bounds = array<i64: 1, 8>}]} {
    %c0 = arith.constant 0 : index
    %c0_0 = arith.constant 0 : index
    %0 = vector.load %arg1[%c0, %c0_0] : memref<8x32xf32, #tpu.memory_space<vmem>>, vector<8x32xf32>
    %c0_1 = arith.constant 0 : index
    %c0_2 = arith.constant 0 : index
    %1 = vector.load %arg2[%c0_1, %c0_2] : memref<32x64xf32, #tpu.memory_space<vmem>>, vector<32x64xf32>
    %cst = arith.constant dense<0.000000e+00> : vector<8x64xf32>
    %2 = tpu.matmul %0, %1, %cst {dimension_numbers = #tpu.dot_dimension_numbers<[1], [0], [0], [1], [0, 0, 1, 1], [], []>} : vector<8x32xf32>, vector<32x64xf32>, vector<8x64xf32> -> vector<8x64xf32>
    %c0_3 = arith.constant 0 : index
    %c0_4 = arith.constant 0 : index
    %3 = vector.load %arg3[%c0_3, %c0_4] : memref<1x64xf32, #tpu.memory_space<vmem>>, vector<1x64xf32>
    %4 = vector.broadcast %3 : vector<1x64xf32> to vector<8x64xf32>
    %5 = arith.addf %2, %4 : vector<8x64xf32>
    %cst_5 = arith.constant 0.000000e+00 : f32
    %6 = vector.broadcast %cst_5 : f32 to vector<8x64xf32>
    %7 = arith.maximumf %5, %6 : vector<8x64xf32>
    %c0_6 = arith.constant 0 : index
    %c0_7 = arith.constant 0 : index
    %8 = vector.load %arg4[%c0_6, %c0_7] : memref<1x64xf32, #tpu.memory_space<vmem>>, vector<1x64xf32>
    %cst_8 = arith.constant dense<0.000000e+00> : vector<1x8xf32>
    %9 = tpu.matmul %8, %7, %cst_8 {dimension_numbers = #tpu.dot_dimension_numbers<[1], [1], [0], [0], [0, 0, 1, 0], [], []>} : vector<1x64xf32>, vector<8x64xf32>, vector<1x8xf32> -> vector<1x8xf32>
    %c0_9 = arith.constant 0 : index
    %c0_10 = arith.constant 0 : index
    %10 = memref.load %arg5[%c0_9, %c0_10] : memref<1x1xf32, #tpu.memory_space<smem>>
    %11 = vector.broadcast %10 : f32 to vector<1x8xf32>
    %12 = arith.addf %9, %11 : vector<1x8xf32>
    %c0_11 = arith.constant 0 : index
    %c0_12 = arith.constant 0 : index
    %13 = vector.load %arg6[%c0_11, %c0_12] : memref<1x8xf32, #tpu.memory_space<vmem>>, vector<1x8xf32>
    tpu.vector_store %arg6[%c0_11, %c0_12], %12 {strides = array<i32>} : memref<1x8xf32, #tpu.memory_space<vmem>>, vector<1x8xf32>,
    return
  }
  func.func @transform_0(%arg0: i32) -> (i32, i32) {
    %c0_i32 = arith.constant 0 : i32
    %c0_i32_0 = arith.constant 0 : i32
    return %arg0, %c0_i32 : i32, i32
  }
  func.func @transform_1(%arg0: i32) -> (i32, i32) {
    %c0_i32 = arith.constant 0 : i32
    %c0_i32_0 = arith.constant 0 : i32
    %c0_i32_1 = arith.constant 0 : i32
    return %c0_i32, %c0_i32_0 : i32, i32
  }
  func.func @transform_2(%arg0: i32) -> (i32, i32) {
    %c0_i32 = arith.constant 0 : i32
    %c0_i32_0 = arith.constant 0 : i32
    %c0_i32_1 = arith.constant 0 : i32
    return %c0_i32, %c0_i32_0 : i32, i32
  }
  func.func @transform_3(%arg0: i32) -> (i32, i32) {
    %c0_i32 = arith.constant 0 : i32
    %c0_i32_0 = arith.constant 0 : i32
    %c0_i32_1 = arith.constant 0 : i32
    return %c0_i32, %c0_i32_0 : i32, i32
  }
  func.func @transform_4(%arg0: i32) -> (i32, i32) {
    %c0_i32 = arith.constant 0 : i32
    %c0_i32_0 = arith.constant 0 : i32
    %c0_i32_1 = arith.constant 0 : i32
    return %c0_i32, %c0_i32_0 : i32, i32
  }
  func.func @transform_5(%arg0: i32) -> (i32, i32) {
    %c0_i32 = arith.constant 0 : i32
    %c0_i32_0 = arith.constant 0 : i32
    return %c0_i32, %arg0 : i32, i32
  }
}

</mosaic_0001>

<bundles_post_ra>
// kernel: tpu_custom_call.1
= control target key start
LH: loop header
LB: loop body
LE: loop exit
PB: predicated region body
PF: predicated region fallthrough
CT: control target
= control target key end

     0   :  { %11 = vsyncpa [#allocation4], 0  ;;  %s276_s0 = inlined_call_operand.hbm [shape: f32[8,32], index: 0, kind: input, shape index: {}]   ;;  %s277_s1 = inlined_call_operand.hbm [shape: f32[32,64], index: 1, kind: input, shape index: {}]   ;;  %s278_s2 = inlined_call_operand.vmem [shape: f32[1,64], index: 2, kind: input, shape index: {}]   ;;  %s279_s3 = inlined_call_operand.vmem [shape: f32[1,64], index: 3, kind: input, shape index: {}]   ;;  %s280_s4 = inlined_call_operand.<no memory space> [shape: f32[1,1], index: 4, kind: input, shape index: {}]   ;;  %s281_s5 = inlined_call_operand.hbm [shape: f32[1,8], index: 5, kind: output, shape index: {}]  }
   0x1   :  { %12 = vsyncpa [#allocation7], 0 }
   0x2   :  { %13 = vsyncpa [#allocation5], 0  ;;  %s19_s20 = sshll.u32 %s276_s0, 4  ;;  %s223_s21 = smov [#allocation3]   ;;  %s20_s20 = int_to_ptr.hbm [resolvable:$true] %s19_s20 }
   0x3   :  { %s21_s22 = sshll.u32 %s223_s21, 4  ;;  %s29_s25 = sshll.u32 %s277_s1, 4  ;;  %s22_s22 = int_to_ptr.vmem [resolvable:$true] %s21_s22  ;;  %s30_s25 = int_to_ptr.hbm [resolvable:$true] %s29_s25 }
   0x4   :  { %24 = dma.hbm_to_vmem [thread:$0]  %s20_s20, 128, %s22_s22, [#allocation4]  }
   0x5   :  { %s224_s26 = smov [#allocation6]   ;;  %s225_s28 = smov 128  }
   0x6   :  { %s31_s27 = sshll.u32 %s224_s26, 4  ;;  %s226_s29 = smov 8   ;;  %s32_s27 = int_to_ptr.vmem [resolvable:$true] %s31_s27 }
   0x7   :  { %37 = dma.hbm_to_vmem [thread:$0]  %s30_s25, 512, %s32_s27, [#allocation7], %s225_s28, %s225_s28, %s226_s29  }
   0x8   :  { %217 = dma.done.wait [#allocation4], 128  }
   0x9   :  { %218 = vsyncadd [#allocation4], 4294967168 }
   0xa   :  { %219 = dma.done.wait [#allocation7], 512  }
   0xb   :  { %220 = vsyncadd [#allocation7], 4294966784  ;;  %v56_v0 = vld [vmem:[#allocation6 + $0x18] sm:$0xff]  ;;  %v55_v1 = vld [vmem:[#allocation6 + $0x10] sm:$0xff]  ;;  %vm61_vm0 = vcmask 261120   ;;  %vm89_vm1 = vcmask 523264   ;;  %v88_v10 = vstv %s280_s4 }
   0xc   :  { %77 = vmatpush.msra.mxu0 %v56_v0  ;;  %v54_v2 = vld [vmem:[#allocation6 + $0x8] sm:$0xff]  ;;  %v53_v3 = vld [vmem:[#allocation6] sm:$0xff]  ;;  %v52_v4 = vld [vmem:[#allocation3] sm:$0xff]  ;;  %s227_s9 = smov [#allocation8]   ;;  %vm116_vm2 = vcmask 57344  }
   0xd   :  { %v144_v5 = vld [vmem:[%s278_s2] ss:$0 sm:$0xff]  ;;  %s123_s10 = sshll.u32 %s227_s9, 4  ;;  %s125_s2 = sshll.u32 %s281_s5, 4  ;;  %s124_s10 = int_to_ptr.vmem [resolvable:$true] %s123_s10  ;;  %s126_s2 = int_to_ptr.hbm [resolvable:$true] %s125_s2 }
   0xe   :  { %78 = vmatpush.msra.mxu0 %v55_v1  ;;  %v86_v9 = vld [vmem:[%s279_s3] sm:$0x1] }
  0x10   :  { %79 = vmatpush.msra.mxu0 %v54_v2 }
  0x12   :  { %80 = vmatpush.msra.mxu0 %v53_v3 }
  0x13   :  { %136 = vmatmul.msk.f32.vlgmr.msra.gmra.mxu0 %vm61_vm0, %v52_v4 }
  0x90   :  { %v82_v6 = vpop.f32.mrf.mxu0 }
  0x91   :  { %v83_v7 = vadd.f32 %v144_v5, %v82_v6 }
  0x93   :  { %v85_v8 = vmax.f32 %v83_v7, 0.0 }
  0x95   :  { %137 = vmatpush.xpose.msk.msra.mxu1 %vm89_vm1, %v85_v8 }
  0x98   :  { %138 = vmatmul.msk.f32.vlgmr.msra.gmra.mxu1 %vm89_vm1, %v86_v9 }
 0x115   :  { %v113_v11 = vpop.f32.mrf.mxu1 }
 0x116   :  { %v114_v12 = vadd.f32 %v113_v11, %v88_v10 }
 0x118   :  { %117 = vst.msk [vmem:[#allocation8] sm:$0x1] %vm116_vm2, %v114_v12 }
 0x119   :  { %128 = dma.vmem_to_hbm [thread:$0]  %s124_s10, 16, %s126_s2, [#allocation5]  }
 0x11a   :  { %221 = dma.done.wait [#allocation5], 16  }
 0x11b   :  { %222 = vsyncadd [#allocation5], 4294967280 }
 0x11c   :  { %133 = vsyncpa [#allocation4], 1 }
 0x11d   :  { %134 = vsyncpa [#allocation7], 1 }
 0x11e   :  { %135 = vsyncpa [#allocation5], 1 }

</bundles_post_ra>
